<compile_context>
chip_gen: v7x
topology: tpu7x:2x2x1
jax: 0.10.0
libtpu: 0.0.40
codegen_flags: <defaults>
</compile_context>

<pallas_src>
import functools

import jax
import jax.numpy as jnp
from jax.experimental import pallas as pl
from jax.experimental.pallas import tpu as pltpu


def _round_up(n, m):
    return ((n + m - 1) // m) * m


def _cdiv(a, b):
    return (a + b - 1) // b


def ae_forward_kernel(x_ref,
                      w1_ref, b1_ref,   # encoder L1 (packed), ReLU
                      w2_ref, b2_ref,   # encoder L2 (packed)
                      w3_ref, b3_ref,   # decoder L1 (packed), ReLU
                      w4_ref, b4_ref,   # decoder L2 (packed)
                      z_ref, out_ref):
    """One (tb/p, p*in_features) lane-packed batch tile of the AE forward."""
    # Hoist biases once per grid step (JAX does not CSE broadcast_in_dim).
    b1 = b1_ref[...].astype(jnp.float32)
    b2 = b2_ref[...].astype(jnp.float32)
    b3 = b3_ref[...].astype(jnp.float32)
    b4 = b4_ref[...].astype(jnp.float32)

    x = x_ref[...]

    # ----- encoder -----
    h = jnp.dot(x, w1_ref[...], preferred_element_type=jnp.float32) + b1
    h = jnp.maximum(h, 0.0)                                   # ReLU
    z = jnp.dot(h.astype(w2_ref.dtype), w2_ref[...],
                preferred_element_type=jnp.float32) + b2
    z_ref[...] = z.astype(z_ref.dtype)

    # ----- decoder(F.relu(z)) -----
    zr = jnp.maximum(z, 0.0)                                  # F.relu(z)
    h2 = jnp.dot(zr.astype(w3_ref.dtype), w3_ref[...],
                 preferred_element_type=jnp.float32) + b3
    h2 = jnp.maximum(h2, 0.0)                                 # ReLU
    out = jnp.dot(h2.astype(w4_ref.dtype), w4_ref[...],
                  preferred_element_type=jnp.float32) + b4
    out_ref[...] = out.astype(out_ref.dtype)


@functools.partial(jax.jit, static_argnames=("p", "block_batch"))
def autoencoder_forward(x, packed_params, *, p=4, block_batch=2048):
    """x: (B, in_features).  packed_params: output of pack_params(): weights
    block-diagonal-packed with factor p in (in, out) layout, biases (1, p*out).
    Returns (z, output) matching AutoEncoder.forward; z is float32."""
    w1, b1, w2, b2, w3, b3, w4, b4 = packed_params
    in_features = w1.shape[0] // p
    latent_dim = w2.shape[1] // p
    B = x.shape[0]
    assert x.shape[1] == in_features

    compute_dtype = w1.dtype
    x = x.astype(compute_dtype)

    # Sublane multiple for the compute dtype (8 f32 / 16 bf16 / 32 int8);
    # a batch tile of tb original rows becomes tb/p packed sublanes.
    sub = {4: 8, 2: 16, 1: 32}[jnp.dtype(compute_dtype).itemsize]
    align = p * sub

    # Tile the batch: biggest tile <= block_batch, total padding < g*align.
    b_req = _round_up(B, align)
    bb = max(align, (min(block_batch, b_req) // align) * align)
    g = _cdiv(b_req, bb)
    tb = _round_up(_cdiv(b_req, g), align)
    b_pad = g * tb
    if b_pad != B:
        x = jnp.pad(x, ((0, b_pad - B), (0, 0)))

    # Lane-pack: (b_pad, in) -> (b_pad/p, p*in); contiguous, free in HBM.
    xp = x.reshape(b_pad // p, p * in_features)
    tbp = tb // p

    def batch_spec(cols):
        return pl.BlockSpec((tbp, cols), lambda i: (i, 0))

    def const_spec(a):
        # Whole array, same block every step -> DMA'd once, VMEM-resident.
        return pl.BlockSpec(a.shape, lambda i: (0, 0))

    zp, outp = pl.pallas_call(
        ae_forward_kernel,
        grid=(b_pad // tb,),
        out_shape=(
            jax.ShapeDtypeStruct((b_pad // p, p * latent_dim), jnp.float32),
            jax.ShapeDtypeStruct((b_pad // p, p * in_features), compute_dtype),
        ),
        in_specs=[
            batch_spec(p * in_features),
            const_spec(w1), const_spec(b1),
            const_spec(w2), const_spec(b2),
            const_spec(w3), const_spec(b3),
            const_spec(w4), const_spec(b4),
        ],
        out_specs=(
            batch_spec(p * latent_dim),
            batch_spec(p * in_features),
        ),
        compiler_params=pltpu.CompilerParams(
            dimension_semantics=("parallel",)),
    )(xp, w1, b1, w2, b2, w3, b3, w4, b4)

    # Un-pack (free, contiguous reshapes) and drop padding rows if any.
    z = zp.reshape(b_pad, latent_dim)
    out = outp.reshape(b_pad, in_features)
    if b_pad != B:
        z = z[:B]
        out = out[:B]
    return z, out


def kaiming_normal_fan_out(key, out_features, in_features):
    """nn.init.kaiming_normal_(w, mode='fan_out', nonlinearity='relu') on a
    (out, in) weight: std = sqrt(2 / fan_out) = sqrt(2 / out_features)."""
    std = (2.0 / out_features) ** 0.5
    return jax.random.normal(key, (out_features, in_features), jnp.float32) * std


def make_params(key, in_features, latent_dim, dtype=jnp.float32):
    """'toy' branch of resolve_layers: hidden = 2*in.  Weights returned
    pre-transposed to (in, out) layout, biases zeroed, shape (1, out)."""
    hidden = in_features * 2
    dims = [
        (in_features, hidden),   # encoder L1
        (hidden, latent_dim),    # encoder L2
        (latent_dim, hidden),    # decoder L1
        (hidden, in_features),   # decoder L2
    ]
    params = []
    for k, (fin, fout) in zip(jax.random.split(key, len(dims)), dims):
        w = kaiming_normal_fan_out(k, fout, fin)         # torch layout (out, in)
        params.append(jnp.asarray(w.T, dtype))           # pre-transpose to (in, out)
        params.append(jnp.zeros((1, fout), dtype))       # bias zeroed, 2D for TPU
    return tuple(params)


def pack_params(params, p=4):
    """Block-diagonal packing done once outside the hot path:
    W (k, n) -> blockdiag(W, ..., W) (p copies) of shape (p*k, p*n);
    b (1, n) -> tiled (1, p*n).  Math is unchanged."""
    packed = []
    for i in range(0, len(params), 2):
        w, b = params[i], params[i + 1]
        eye = jnp.eye(p, dtype=w.dtype)
        packed.append(jnp.kron(eye, w))          # block-diagonal
        packed.append(jnp.tile(b, (1, p)))
    return tuple(packed)


def reference_forward(x, params):
    """Pure-JAX reference matching the PyTorch forward semantics."""
    w1, b1, w2, b2, w3, b3, w4, b4 = params
    h = jnp.maximum(x @ w1 + b1, 0.0)
    z = h @ w2 + b2
    zr = jnp.maximum(z, 0.0)
    h2 = jnp.maximum(zr @ w3 + b3, 0.0)
    out = h2 @ w4 + b4
    return z, out


if __name__ == "__main__":
    key = jax.random.PRNGKey(0)
    k_x, k_p, k_x2 = jax.random.split(key, 3)

    in_features = 32
    latent_dim = 4
    P = 4   # lane-packing factor: P * in_features == 128 lanes

    params = make_params(k_p, in_features, latent_dim, dtype=jnp.float32)
    packed = pack_params(params, p=P)

    # Case 1: multi-step "parallel" grid (2 tiles of 256 rows), f32 I/O.
    batch = 512
    x = jax.random.normal(k_x, (batch, in_features), dtype=jnp.float32)
    z, out = autoencoder_forward(x, packed, p=P, block_batch=256)
    jax.block_until_ready((z, out))
    z_ref, out_ref = reference_forward(x, params)
    assert z.shape == (batch, latent_dim) and out.shape == (batch, in_features)
    assert jnp.allclose(z, z_ref, atol=1e-4, rtol=1e-4)
    assert jnp.allclose(out, out_ref, atol=1e-4, rtol=1e-4)

    # Case 2: ragged batch -> padded only to the 32-row alignment, then sliced.
    batch2 = 100
    x2 = jax.random.normal(k_x2, (batch2, in_features), dtype=jnp.float32)
    z2, out2 = autoencoder_forward(x2, packed, p=P, block_batch=256)
    jax.block_until_ready((z2, out2))
    z2_ref, out2_ref = reference_forward(x2, params)
    assert z2.shape == (batch2, latent_dim) and out2.shape == (batch2, in_features)
    assert jnp.allclose(z2, z2_ref, atol=1e-4, rtol=1e-4)
    assert jnp.allclose(out2, out2_ref, atol=1e-4, rtol=1e-4)

    # Case 3: bf16 I/O (f32 accumulation inside; returned z stays f32).
    params_bf16 = tuple(a.astype(jnp.bfloat16) for a in params)
    packed_bf16 = pack_params(params_bf16, p=P)
    x_bf16 = x.astype(jnp.bfloat16)
    z3, out3 = autoencoder_forward(x_bf16, packed_bf16, p=P, block_batch=256)
    jax.block_until_ready((z3, out3))
    params_bf_as_f32 = tuple(a.astype(jnp.float32) for a in params_bf16)
    z3_ref, out3_ref = reference_forward(x_bf16.astype(jnp.float32),
                                         params_bf_as_f32)
    assert z3.dtype == jnp.float32 and out3.dtype == jnp.bfloat16
    assert z3.shape == (batch, latent_dim) and out3.shape == (batch, in_features)
    assert jnp.allclose(z3, z3_ref, atol=0.5, rtol=0.05)
    assert jnp.allclose(out3.astype(jnp.float32), out3_ref, atol=0.5, rtol=0.05)

    print("KERNEL_OK")
</pallas_src>

<mosaic_0001>
module attributes {stable_mosaic.version = 11 : i64} {
  func.func @ae_forward_kernel(%arg0: i32, %arg1: memref<64x128xf32, #tpu.memory_space<vmem>>, %arg2: memref<128x256xf32, #tpu.memory_space<vmem>>, %arg3: memref<1x256xf32, #tpu.memory_space<vmem>>, %arg4: memref<256x16xf32, #tpu.memory_space<vmem>>, %arg5: memref<1x16xf32, #tpu.memory_space<vmem>>, %arg6: memref<16x256xf32, #tpu.memory_space<vmem>>, %arg7: memref<1x256xf32, #tpu.memory_space<vmem>>, %arg8: memref<256x128xf32, #tpu.memory_space<vmem>>, %arg9: memref<1x128xf32, #tpu.memory_space<vmem>>, %arg10: memref<64x16xf32, #tpu.memory_space<vmem>>, %arg11: memref<64x128xf32, #tpu.memory_space<vmem>>) attributes {dimension_semantics = [#tpu.dimension_semantics<parallel>], iteration_bounds = array<i64: 2>, scalar_prefetch = 0 : i64, scratch_operands = 0 : i64, tpu.core_type = #tpu.core_type<tc>, window_params = [{transform_indices = @transform_0, window_bounds = array<i64: 64, 128>}, {pipeline_mode = #tpu.pipeline_mode<synchronous>, transform_indices = @transform_1, window_bounds = array<i64: 128, 256>}, {pipeline_mode = #tpu.pipeline_mode<synchronous>, transform_indices = @transform_2, window_bounds = array<i64: 1, 256>}, {pipeline_mode = #tpu.pipeline_mode<synchronous>, transform_indices = @transform_3, window_bounds = array<i64: 256, 16>}, {pipeline_mode = #tpu.pipeline_mode<synchronous>, transform_indices = @transform_4, window_bounds = array<i64: 1, 16>}, {pipeline_mode = #tpu.pipeline_mode<synchronous>, transform_indices = @transform_5, window_bounds = array<i64: 16, 256>}, {pipeline_mode = #tpu.pipeline_mode<synchronous>, transform_indices = @transform_6, window_bounds = array<i64: 1, 256>}, {pipeline_mode = #tpu.pipeline_mode<synchronous>, transform_indices = @transform_7, window_bounds = array<i64: 256, 128>}, {pipeline_mode = #tpu.pipeline_mode<synchronous>, transform_indices = @transform_8, window_bounds = array<i64: 1, 128>}, {transform_indices = @transform_9, window_bounds = array<i64: 64, 16>}, {transform_indices = @transform_10, window_bounds = array<i64: 64, 128>}]} {
    %c0 = arith.constant 0 : index
    %c0_0 = arith.constant 0 : index
    %0 = vector.load %arg3[%c0, %c0_0] : memref<1x256xf32, #tpu.memory_space<vmem>>, vector<1x256xf32>
    %c0_1 = arith.constant 0 : index
    %c0_2 = arith.constant 0 : index
    %1 = vector.load %arg5[%c0_1, %c0_2] : memref<1x16xf32, #tpu.memory_space<vmem>>, vector<1x16xf32>
    %c0_3 = arith.constant 0 : index
    %c0_4 = arith.constant 0 : index
    %2 = vector.load %arg7[%c0_3, %c0_4] : memref<1x256xf32, #tpu.memory_space<vmem>>, vector<1x256xf32>
    %c0_5 = arith.constant 0 : index
    %c0_6 = arith.constant 0 : index
    %3 = vector.load %arg9[%c0_5, %c0_6] : memref<1x128xf32, #tpu.memory_space<vmem>>, vector<1x128xf32>
    %c0_7 = arith.constant 0 : index
    %c0_8 = arith.constant 0 : index
    %4 = vector.load %arg1[%c0_7, %c0_8] : memref<64x128xf32, #tpu.memory_space<vmem>>, vector<64x128xf32>
    %c0_9 = arith.constant 0 : index
    %c0_10 = arith.constant 0 : index
    %5 = vector.load %arg2[%c0_9, %c0_10] : memref<128x256xf32, #tpu.memory_space<vmem>>, vector<128x256xf32>
    %cst = arith.constant dense<0.000000e+00> : vector<64x256xf32>
    %6 = tpu.matmul %4, %5, %cst {dimension_numbers = #tpu.dot_dimension_numbers<[1], [0], [0], [1], [0, 0, 1, 1], [], []>} : vector<64x128xf32>, vector<128x256xf32>, vector<64x256xf32> -> vector<64x256xf32>
    %7 = vector.broadcast %0 : vector<1x256xf32> to vector<64x256xf32>
    %8 = arith.addf %6, %7 : vector<64x256xf32>
    %cst_11 = arith.constant 0.000000e+00 : f32
    %9 = vector.broadcast %cst_11 : f32 to vector<64x256xf32>
    %10 = arith.maximumf %8, %9 : vector<64x256xf32>
    %c0_12 = arith.constant 0 : index
    %c0_13 = arith.constant 0 : index
    %11 = vector.load %arg4[%c0_12, %c0_13] : memref<256x16xf32, #tpu.memory_space<vmem>>, vector<256x16xf32>
    %cst_14 = arith.constant dense<0.000000e+00> : vector<64x16xf32>
    %12 = tpu.matmul %10, %11, %cst_14 {dimension_numbers = #tpu.dot_dimension_numbers<[1], [0], [0], [1], [0, 0, 1, 1], [], []>} : vector<64x256xf32>, vector<256x16xf32>, vector<64x16xf32> -> vector<64x16xf32>
    %13 = vector.broadcast %1 : vector<1x16xf32> to vector<64x16xf32>
    %14 = arith.addf %12, %13 : vector<64x16xf32>
    %c0_15 = arith.constant 0 : index
    %c0_16 = arith.constant 0 : index
    %15 = vector.load %arg10[%c0_15, %c0_16] : memref<64x16xf32, #tpu.memory_space<vmem>>, vector<64x16xf32>
    tpu.vector_store %arg10[%c0_15, %c0_16], %14 {strides = array<i32>} : memref<64x16xf32, #tpu.memory_space<vmem>>, vector<64x16xf32>,
    %cst_17 = arith.constant 0.000000e+00 : f32
    %16 = vector.broadcast %cst_17 : f32 to vector<64x16xf32>
    %17 = arith.maximumf %14, %16 : vector<64x16xf32>
    %c0_18 = arith.constant 0 : index
    %c0_19 = arith.constant 0 : index
    %18 = vector.load %arg6[%c0_18, %c0_19] : memref<16x256xf32, #tpu.memory_space<vmem>>, vector<16x256xf32>
    %cst_20 = arith.constant dense<0.000000e+00> : vector<64x256xf32>
    %19 = tpu.matmul %17, %18, %cst_20 {dimension_numbers = #tpu.dot_dimension_numbers<[1], [0], [0], [1], [0, 0, 1, 1], [], []>} : vector<64x16xf32>, vector<16x256xf32>, vector<64x256xf32> -> vector<64x256xf32>
    %20 = vector.broadcast %2 : vector<1x256xf32> to vector<64x256xf32>
    %21 = arith.addf %19, %20 : vector<64x256xf32>
    %cst_21 = arith.constant 0.000000e+00 : f32
    %22 = vector.broadcast %cst_21 : f32 to vector<64x256xf32>
    %23 = arith.maximumf %21, %22 : vector<64x256xf32>
    %c0_22 = arith.constant 0 : index
    %c0_23 = arith.constant 0 : index
    %24 = vector.load %arg8[%c0_22, %c0_23] : memref<256x128xf32, #tpu.memory_space<vmem>>, vector<256x128xf32>
    %cst_24 = arith.constant dense<0.000000e+00> : vector<64x128xf32>
    %25 = tpu.matmul %23, %24, %cst_24 {dimension_numbers = #tpu.dot_dimension_numbers<[1], [0], [0], [1], [0, 0, 1, 1], [], []>} : vector<64x256xf32>, vector<256x128xf32>, vector<64x128xf32> -> vector<64x128xf32>
    %26 = vector.broadcast %3 : vector<1x128xf32> to vector<64x128xf32>
    %27 = arith.addf %25, %26 : vector<64x128xf32>
    %c0_25 = arith.constant 0 : index
    %c0_26 = arith.constant 0 : index
    %28 = vector.load %arg11[%c0_25, %c0_26] : memref<64x128xf32, #tpu.memory_space<vmem>>, vector<64x128xf32>
    tpu.vector_store %arg11[%c0_25, %c0_26], %27 {strides = array<i32>} : memref<64x128xf32, #tpu.memory_space<vmem>>, vector<64x128xf32>,
    return
  }
  func.func @transform_0(%arg0: i32) -> (i32, i32) {
    %c0_i32 = arith.constant 0 : i32
    %c0_i32_0 = arith.constant 0 : i32
    return %arg0, %c0_i32 : i32, i32
  }
  func.func @transform_1(%arg0: i32) -> (i32, i32) {
    %c0_i32 = arith.constant 0 : i32
    %c0_i32_0 = arith.constant 0 : i32
    %c0_i32_1 = arith.constant 0 : i32
    return %c0_i32, %c0_i32_0 : i32, i32
  }
  func.func @transform_2(%arg0: i32) -> (i32, i32) {
    %c0_i32 = arith.constant 0 : i32
    %c0_i32_0 = arith.constant 0 : i32
    %c0_i32_1 = arith.constant 0 : i32
    return %c0_i32, %c0_i32_0 : i32, i32
  }
  func.func @transform_3(%arg0: i32) -> (i32, i32) {
    %c0_i32 = arith.constant 0 : i32
    %c0_i32_0 = arith.constant 0 : i32
    %c0_i32_1 = arith.constant 0 : i32
    return %c0_i32, %c0_i32_0 : i32, i32
  }
  func.func @transform_4(%arg0: i32) -> (i32, i32) {
    %c0_i32 = arith.constant 0 : i32
    %c0_i32_0 = arith.constant 0 : i32
    %c0_i32_1 = arith.constant 0 : i32
    return %c0_i32, %c0_i32_0 : i32, i32
  }
  func.func @transform_5(%arg0: i32) -> (i32, i32) {
    %c0_i32 = arith.constant 0 : i32
    %c0_i32_0 = arith.constant 0 : i32
    %c0_i32_1 = arith.constant 0 : i32
    return %c0_i32, %c0_i32_0 : i32, i32
  }
  func.func @transform_6(%arg0: i32) -> (i32, i32) {
    %c0_i32 = arith.constant 0 : i32
    %c0_i32_0 = arith.constant 0 : i32
    %c0_i32_1 = arith.constant 0 : i32
    return %c0_i32, %c0_i32_0 : i32, i32
  }
  func.func @transform_7(%arg0: i32) -> (i32, i32) {
    %c0_i32 = arith.constant 0 : i32
    %c0_i32_0 = arith.constant 0 : i32
    %c0_i32_1 = arith.constant 0 : i32
    return %c0_i32, %c0_i32_0 : i32, i32
  }
  func.func @transform_8(%arg0: i32) -> (i32, i32) {
    %c0_i32 = arith.constant 0 : i32
    %c0_i32_0 = arith.constant 0 : i32
    %c0_i32_1 = arith.constant 0 : i32
    return %c0_i32, %c0_i32_0 : i32, i32
  }
  func.func @transform_9(%arg0: i32) -> (i32, i32) {
    %c0_i32 = arith.constant 0 : i32
    %c0_i32_0 = arith.constant 0 : i32
    return %arg0, %c0_i32 : i32, i32
  }
  func.func @transform_10(%arg0: i32) -> (i32, i32) {
    %c0_i32 = arith.constant 0 : i32
    %c0_i32_0 = arith.constant 0 : i32
    return %arg0, %c0_i32 : i32, i32
  }
}

</mosaic_0001>

<bundles_post_ra>
// kernel: autoencoder_forward.1
= control target key start
LH: loop header
LB: loop body
LE: loop exit
PB: predicated region body
PF: predicated region fallthrough
CT: control target
= control target key end

     0   :  { %s1438_s13 = smov 0   ;;  %s1857_s0 = inlined_call_operand.vmem [shape: f32[128,128], index: 0, kind: input, shape index: {}]   ;;  %s1858_s1 = inlined_call_operand.vmem [shape: f32[128,256], index: 1, kind: input, shape index: {}]   ;;  %s1859_s2 = inlined_call_operand.vmem [shape: f32[1,256], index: 2, kind: input, shape index: {}]   ;;  %s1860_s3 = inlined_call_operand.vmem [shape: f32[256,16], index: 3, kind: input, shape index: {}]   ;;  %s1861_s4 = inlined_call_operand.vmem [shape: f32[1,16], index: 4, kind: input, shape index: {}]   ;;  %s1862_s5 = inlined_call_operand.vmem [shape: f32[16,256], index: 5, kind: input, shape index: {}]   ;;  %s1863_s6 = inlined_call_operand.vmem [shape: f32[1,256], index: 6, kind: input, shape index: {}]   ;;  %s1864_s7 = inlined_call_operand.vmem [shape: f32[256,128], index: 7, kind: input, shape index: {}]   ;;  %s1865_s8 = inlined_call_operand.vmem [shape: f32[1,128], index: 8, kind: input, shape index: {}]   ;;  %s1866_s9 = inlined_call_operand.vmem [shape: f32[128,16], index: 9, kind: output, shape index: {0}]   ;;  %s1867_s10 = inlined_call_operand.vmem [shape: f32[128,128], index: 10, kind: output, shape index: {1}]  }
   0x1 LB: > { %s1130_s14 = sadd.s32 4294967295, %s1380_s13   ;;  %p1134_p0 = scmp.ge.s32.totalorder %s1380_s13, 1  ;;  %s1380_s13 = sphi %s1438_s13, %s21_s13  }
   0x2   : > { %p316_p1 = scmp.lt.s32.totalorder %s1380_s13, 3 }
   0x4   : > { %p317_p2 = pnand %p1134_p0, %p316_p1 }
   0x5   : > { %v390_v0 = vld [vmem:[%s1858_s1 + $0x8] sm:$0xff] (!%p317_p2)  ;;  %v392_v1 = vld [vmem:[%s1858_s1 + $0x18] sm:$0xff] (!%p317_p2)  ;;  %v389_v2 = vld [vmem:[%s1858_s1] sm:$0xff] (!%p317_p2)  ;;  %v1382_v7 = vmov (!%p317_p2), 0.0   ;;  %s1530_s15 = sshll.u32 (!%p317_p2), %s1130_s14, 3  ;;  %vm704_vm0 = vcmask (!%p317_p2), 130048  }
   0x6   : > { %320 = sbr.rel (%p317_p2) target bundleno = 941 (0x3ad), region = 56  ;;  %v1265_v3 = vpack.c.bf16 (!%p317_p2), %v392_v1, %v390_v0  ;;  %v391_v4 = vld [vmem:[%s1858_s1 + $0x10] sm:$0xff] (!%p317_p2)  ;;  %v394_v5 = vld [vmem:[%s1858_s1 + $0x28] sm:$0xff] (!%p317_p2)  ;;  %v396_v6 = vld [vmem:[%s1858_s1 + $0x38] sm:$0xff] (!%p317_p2)  ;;  %496 = vmatprep.mubr.f32.mxu0 (!%p317_p2), %v1382_v7  ;;  %p360_p3 = scmp.lt.s32.totalorder (!%p317_p2), %s1530_s15, 15 }
   0x7   : > { %v1267_v8 = vpack.c.bf16 (!%p317_p2), %v391_v4, %v389_v2  ;;  %v1269_v9 = vpack.c.bf16 (!%p317_p2), %v396_v6, %v394_v5  ;;  %v393_v10 = vld [vmem:[%s1858_s1 + $0x20] sm:$0xff] (!%p317_p2)  ;;  %v395_v11 = vld [vmem:[%s1858_s1 + $0x30] sm:$0xff] (!%p317_p2)  ;;  %v398_v12 = vld [vmem:[%s1858_s1 + $0x48] sm:$0xff] (!%p317_p2) }
   0x8   : > { %1266 = vmatprep.subr.bf16.mxu0 (!%p317_p2), %v1265_v3  ;;  %v400_v13 = vld [vmem:[%s1858_s1 + $0x58] sm:$0xff] (!%p317_p2)  ;;  %v1271_v14 = vpack.c.bf16 (!%p317_p2), %v395_v11, %v393_v10  ;;  %v397_v16 = vld [vmem:[%s1858_s1 + $0x40] sm:$0xff] (!%p317_p2)  ;;  %v399_v17 = vld [vmem:[%s1858_s1 + $0x50] sm:$0xff] (!%p317_p2) }
   0x9   : > { %1268 = vmatpush1.bf16.msra.mxu0 (!%p317_p2), %v1267_v8  ;;  %v1273_v15 = vpack.c.bf16 (!%p317_p2), %v400_v13, %v398_v12  ;;  %v402_v18 = vld [vmem:[%s1858_s1 + $0x68] sm:$0xff] (!%p317_p2)  ;;  %v404_v19 = vld [vmem:[%s1858_s1 + $0x78] sm:$0xff] (!%p317_p2)  ;;  %v1275_v20 = vpack.c.bf16 (!%p317_p2), %v399_v17, %v397_v16  ;;  %v401_v22 = vld [vmem:[%s1858_s1 + $0x60] sm:$0xff] (!%p317_p2) }
   0xa   : > { %1270 = vmatprep.subr.bf16.mxu0 (!%p317_p2), %v1269_v9  ;;  %v1277_v21 = vpack.c.bf16 (!%p317_p2), %v404_v19, %v402_v18  ;;  %v403_v23 = vld [vmem:[%s1858_s1 + $0x70] sm:$0xff] (!%p317_p2)  ;;  %v406_v24 = vld [vmem:[%s1858_s1 + $0x88] sm:$0xff] (!%p317_p2)  ;;  %v408_v25 = vld [vmem:[%s1858_s1 + $0x98] sm:$0xff] (!%p317_p2) }
   0xb   : > { %v1279_v26 = vpack.c.bf16 (!%p317_p2), %v403_v23, %v401_v22  ;;  %v405_v27 = vld [vmem:[%s1858_s1 + $0x80] sm:$0xff] (!%p317_p2)  ;;  %v407_v28 = vld [vmem:[%s1858_s1 + $0x90] sm:$0xff] (!%p317_p2)  ;;  %v410_v29 = vld [vmem:[%s1858_s1 + $0xa8] sm:$0xff] (!%p317_p2)  ;;  %v1281_v30 = vpack.c.bf16 (!%p317_p2), %v408_v25, %v406_v24 }
   0xc   : > { %v412_v31 = vld [vmem:[%s1858_s1 + $0xb8] sm:$0xff] (!%p317_p2)  ;;  %v577_v32 = vld [vmem:[%s1860_s3 + $0x80] sm:$0xff] (!%p317_p2)  ;;  %v578_v33 = vld [vmem:[%s1860_s3 + $0x88] sm:$0xff] (!%p317_p2)  ;;  %v1283_v42 = vpack.c.bf16 (!%p317_p2), %v407_v28, %v405_v27 }
   0xd   : > { %1272 = vmatpush1.bf16.msra.mxu0 %v1271_v14  ;;  %v1297_v34 = vpack.c.bf16 %v578_v33, %v577_v32  ;;  %v561_v35 = vld [vmem:[%s1860_s3] sm:$0xff]  ;;  %v562_v36 = vld [vmem:[%s1860_s3 + $0x8] sm:$0xff]  ;;  %v579_v37 = vld [vmem:[%s1860_s3 + $0x90] sm:$0xff]  ;;  %v1285_v46 = vpack.c.bf16 %v412_v31, %v410_v29  ;;  %s1869_s15 = smov (!%p360_p3, %s1530_s15), 15 }
   0xe   : > { %1274 = vmatprep.subr.bf16.mxu0 %v1273_v15  ;;  %v1299_v38 = vpack.c.bf16 %v562_v36, %v561_v35  ;;  %v580_v39 = vld [vmem:[%s1860_s3 + $0x98] sm:$0xff]  ;;  %v563_v40 = vld [vmem:[%s1860_s3 + $0x10] sm:$0xff]  ;;  %v581_v44 = vld [vmem:[%s1860_s3 + $0xa0] sm:$0xff]  ;;  %s1605_s25 = sshll.u32 %s1869_s15, 3 }
   0xf   : > { %v564_v41 = vld [vmem:[%s1860_s3 + $0x18] sm:$0xff]  ;;  %1298 = vmatprep.subr.bf16.mxu1 %v1297_v34  ;;  %v1301_v43 = vpack.c.bf16 %v580_v39, %v579_v37  ;;  %v582_v45 = vld [vmem:[%s1860_s3 + $0xa8] sm:$0xff]  ;;  %v409_v47 = vld [vmem:[%s1858_s1 + $0xa0] sm:$0xff]  ;;  %s1623_s18 = scalar_lea.vmem %s1857_s0, %s1605_s25  ;;  %s1785_s19 = scalar_lea.vmem %s1866_s9, %s1605_s25 }
  0x10   : > { %v411_v48 = vld [vmem:[%s1858_s1 + $0xb0] sm:$0xff]  ;;  %v414_v49 = vld [vmem:[%s1858_s1 + $0xc8] sm:$0xff]  ;;  %1300 = vmatpush3.bf16.msra.mxu1 %v1299_v38  ;;  %v1303_v50 = vpack.c.bf16 %v564_v41, %v563_v40  ;;  %v416_v51 = vld [vmem:[%s1858_s1 + $0xd8] sm:$0xff]  ;;  %v1305_v52 = vpack.c.bf16 %v582_v45, %v581_v44  ;;  %s1844_s15 = scalar_lea.vmem %s1867_s10, %s1605_s25 }
  0x11   : > { %1276 = vmatpush1.bf16.msra.mxu0 %v1275_v20  ;;  %1302 = vmatprep.subr.bf16.mxu1 %v1301_v43  ;;  %v565_v53 = vld [vmem:[%s1860_s3 + $0x20] sm:$0xff]  ;;  %v566_v54 = vld [vmem:[%s1860_s3 + $0x28] sm:$0xff]  ;;  %v583_v55 = vld [vmem:[%s1860_s3 + $0xb0] sm:$0xff]  ;;  %v1287_v57 = vpack.c.bf16 %v411_v48, %v409_v47  ;;  %v1289_v58 = vpack.c.bf16 %v416_v51, %v414_v49  ;;  %v422_v48 = vlaneseq }
  0x12   : > { %1278 = vmatprep.subr.bf16.mxu0 %v1277_v21  ;;  %v584_v56 = vld [vmem:[%s1860_s3 + $0xb8] sm:$0xff]  ;;  %v413_v59 = vld [vmem:[%s1858_s1 + $0xc0] sm:$0xff]  ;;  %v415_v60 = vld [vmem:[%s1858_s1 + $0xd0] sm:$0xff]  ;;  %v1307_v62 = vpack.c.bf16 %v566_v54, %v565_v53 }
  0x13   : > { %v418_v61 = vld [vmem:[%s1858_s1 + $0xe8] sm:$0xff]  ;;  %v420_v63 = vld [vmem:[%s1858_s1 + $0xf8] sm:$0xff]  ;;  %v1309_v0 = vpack.c.bf16 %v584_v56, %v583_v55  ;;  %v567_v1 = vld [vmem:[%s1860_s3 + $0x30] sm:$0xff]  ;;  %v1291_v5 = vpack.c.bf16 %v415_v60, %v413_v59  ;;  %v1683_v49 = vshrl.u32 %v422_v48, 7 }
  0x14   : > { %1304 = vmatpush3.bf16.msra.mxu1 %v1303_v50  ;;  %v568_v2 = vld [vmem:[%s1860_s3 + $0x38] sm:$0xff]  ;;  %v585_v3 = vld [vmem:[%s1860_s3 + $0xc0] sm:$0xff]  ;;  %v586_v4 = vld [vmem:[%s1860_s3 + $0xc8] sm:$0xff]  ;;  %v1293_v6 = vpack.c.bf16 %v420_v63, %v418_v61 }
  0x15   : > { %1280 = vmatpush1.bf16.msra.mxu0 %v1279_v26  ;;  %1306 = vmatprep.subr.bf16.mxu1 %v1305_v52  ;;  %v417_v8 = vld [vmem:[%s1858_s1 + $0xe0] sm:$0xff]  ;;  %v419_v9 = vld [vmem:[%s1858_s1 + $0xf0] sm:$0xff]  ;;  %v1311_v10 = vpack.c.bf16 %v568_v2, %v567_v1  ;;  %v1313_v11 = vpack.c.bf16 %v586_v4, %v585_v3  ;;  %v570_v13 = vld [vmem:[%s1860_s3 + $0x48] sm:$0xff]  ;;  %v424_v50 = vsub.s32 0, %v1683_v49  ;;  %v428_v52 = vsub.s32 1, %v1683_v49 }
  0x16   : > { %1282 = vmatprep.subr.bf16.mxu0 %v1281_v30  ;;  %v569_v12 = vld [vmem:[%s1860_s3 + $0x40] sm:$0xff]  ;;  %v587_v14 = vld [vmem:[%s1860_s3 + $0xd0] sm:$0xff]  ;;  %v588_v15 = vld [vmem:[%s1860_s3 + $0xd8] sm:$0xff]  ;;  %v1295_v16 = vpack.c.bf16 %v419_v9, %v417_v8 }
  0x17   : > { %v1315_v17 = vpack.c.bf16 %v570_v13, %v569_v12  ;;  %v1317_v18 = vpack.c.bf16 %v588_v15, %v587_v14  ;;  %v571_v19 = vld [vmem:[%s1860_s3 + $0x50] sm:$0xff]  ;;  %v572_v20 = vld [vmem:[%s1860_s3 + $0x58] sm:$0xff]  ;;  %v589_v21 = vld [vmem:[%s1860_s3 + $0xe0] sm:$0xff] }
  0x18   : > { %1308 = vmatpush3.bf16.msra.mxu1 %v1307_v62  ;;  %v590_v22 = vld [vmem:[%s1860_s3 + $0xe8] sm:$0xff]  ;;  %v381_v23 = vld [vmem:[%s1623_s18] sm:$0xff]  ;;  %v1319_v24 = vpack.c.bf16 %v572_v20, %v571_v19  ;;  %v383_v27 = vld [vmem:[%s1623_s18 + $0x10] sm:$0xff] }
  0x19   : > { %1284 = vmatpush1.bf16.msra.mxu0 %v1283_v42  ;;  %1310 = vmatprep.subr.bf16.mxu1 %v1309_v0  ;;  %v1321_v25 = vpack.c.bf16 %v590_v22, %v589_v21  ;;  %v382_v26 = vld [vmem:[%s1623_s18 + $0x8] sm:$0xff]  ;;  %v384_v28 = vld [vmem:[%s1623_s18 + $0x18] sm:$0xff]  ;;  %v385_v29 = vld [vmem:[%s1623_s18 + $0x20] sm:$0xff] }
  0x1a   : > { %1286 = vmatprep.subr.bf16.mxu0 %v1285_v46  ;;  %v386_v30 = vld [vmem:[%s1623_s18 + $0x28] sm:$0xff]  ;;  %v387_v31 = vld [vmem:[%s1623_s18 + $0x30] sm:$0xff]  ;;  %v388_v32 = vld [vmem:[%s1623_s18 + $0x38] sm:$0xff] }
  0x1b   : > { %v573_v33 = vld [vmem:[%s1860_s3 + $0x60] sm:$0xff]  ;;  %v574_v34 = vld [vmem:[%s1860_s3 + $0x68] sm:$0xff]  ;;  %v591_v36 = vld [vmem:[%s1860_s3 + $0xf0] sm:$0xff] }
  0x1c   : > { %1312 = vmatpush3.bf16.msra.mxu1 %v1311_v10  ;;  %v1323_v35 = vpack.c.bf16 %v574_v34, %v573_v33  ;;  %v592_v37 = vld [vmem:[%s1860_s3 + $0xf8] sm:$0xff]  ;;  %v575_v39 = vld [vmem:[%s1860_s3 + $0x70] sm:$0xff]  ;;  %v722_v42 = vld [vmem:[%s1862_s5 + $0x8] sm:$0xff] }
  0x1d   : > { %1288 = vmatpush1.bf16.msra.mxu0 %v1287_v57  ;;  %1314 = vmatprep.subr.bf16.mxu1 %v1313_v11  ;;  %v1325_v38 = vpack.c.bf16 %v592_v37, %v591_v36  ;;  %v576_v40 = vld [vmem:[%s1860_s3 + $0x78] sm:$0xff]  ;;  %v721_v44 = vld [vmem:[%s1862_s5] sm:$0xff]  ;;  %v723_v46 = vld [vmem:[%s1862_s5 + $0x10] sm:$0xff] }
  0x1e   : > { %1290 = vmatprep.subr.bf16.mxu0 %v1289_v58  ;;  %v1327_v41 = vpack.c.bf16 %v576_v40, %v575_v39  ;;  %v724_v43 = vld [vmem:[%s1862_s5 + $0x18] sm:$0xff]  ;;  %v1331_v47 = vpack.c.bf16 %v723_v46, %v721_v44  ;;  %v377_v51 = vld [vmem:[%s1859_s2] sm:$0x3]  ;;  %v890_v44 = vld [vmem:[%s1864_s7 + $0x8] sm:$0xff] }
  0x1f   : > { %v1329_v45 = vpack.c.bf16 %v724_v43, %v722_v42  ;;  %v425_v53 = vrot.slane %v377_v51, %v424_v50  ;;  %v429_v54 = vrot.slane %v377_v51, %v428_v52  ;;  %v905_v40 = vld [vmem:[%s1864_s7 + $0x80] sm:$0xff]  ;;  %v908_v46 = vld [vmem:[%s1864_s7 + $0x98] sm:$0xff]  ;;  %v891_v51 = vld [vmem:[%s1864_s7 + $0x10] sm:$0xff] }
  0x20   : > { %1316 = vmatpush3.bf16.msra.mxu1 %v1315_v17  ;;  %v889_v42 = vld [vmem:[%s1864_s7] sm:$0xff] }
  0x21   : > { %1292 = vmatpush1.bf16.msra.mxu0 %v1291_v5  ;;  %1318 = vmatprep.subr.bf16.mxu1 %v1317_v18 }
  0x22   : > { %1294 = vmatprep.subr.bf16.mxu0 %v1293_v6 }
  0x24   : > { %1320 = vmatpush3.bf16.msra.mxu1 %v1319_v24 }
  0x25   : > { %1296 = vmatpush1.bf16.msra.mxu0 %v1295_v16  ;;  %1322 = vmatprep.subr.bf16.mxu1 %v1321_v25 }
  0x26   : > { %1330 = vmatprep.subr.bf16.mxu0 %v1329_v45  ;;  %v907_v45 = vld [vmem:[%s1864_s7 + $0x90] sm:$0xff] }
  0x27   : > { %v1337_v48 = vpack.c.bf16 %v908_v46, %v907_v45 }
  0x28   : > { %497 = vmatmul.mubr.f32.vlgmr.msra.gmra.mrb[0].mxu0 %v381_v23  ;;  %1324 = vmatpush3.bf16.msra.mxu1 %v1323_v35 }
  0x29   : > { %502 = vmatprep.mubr.f32.mxu0 %v1382_v7  ;;  %1326 = vmatprep.subr.bf16.mxu1 %v1325_v38 }
  0x2a   : > { %1332 = vmatpush1.bf16.msra.mxu0 %v1331_v47  ;;  %v1335_v47 = vpack.c.bf16 %v890_v44, %v889_v42 }
  0x2c   : > { %503 = vmatmul.mubr.f32.gmra.mrb[2].mxu0 %v382_v26  ;;  %1328 = vmatpush3.bf16.msra.mxu1 %v1327_v41  ;;  %v906_v41 = vld [vmem:[%s1864_s7 + $0x88] sm:$0xff] }
  0x2d   : > { %508 = vmatprep.mubr.f32.mxu0 %v1382_v7  ;;  %v1333_v43 = vpack.c.bf16 %v906_v41, %v905_v40 }
  0x2f   : > { %1334 = vmatprep.subr.bf16.mxu1 %v1333_v43 }
  0x30   : > { %509 = vmatmul.mubr.f32.gmra.mrb[4].mxu0 %v383_v27 }
  0x31   : > { %514 = vmatprep.mubr.f32.mxu0 %v1382_v7 }
  0x34   : > { %515 = vmatmul.mubr.f32.gmra.mrb[6].mxu0 %v384_v28 }
  0x35   : > { %520 = vmatprep.mubr.f32.mxu0 %v1382_v7 }
  0x38   : > { %521 = vmatmul.mubr.f32.gmra.mrb[8].mxu0 %v385_v29 }
  0x39   : > { %526 = vmatprep.mubr.f32.mxu0 %v1382_v7 }
  0x3c   : > { %527 = vmatmul.mubr.f32.gmra.mrb[10].mxu0 %v386_v30 }
  0x3d   : > { %532 = vmatprep.mubr.f32.mxu0 %v1382_v7 }
  0x40   : > { %533 = vmatmul.mubr.f32.gmra.mrb[12].mxu0 %v387_v31 }
  0x41   : > { %538 = vmatprep.mubr.f32.mxu0 %v1382_v7 }
  0x44   : > { %539 = vmatmul.mubr.f32.gmra.mrb[14].mxu0 %v388_v32 }
  0x45   : > { %824 = vmatprep.mubr.f32.mxu0 %v1382_v7 }
  0xfb   : > { %v498_v55 = vpop.f32.mrb[0].mxu0 }
  0xfc   : > { %v499_v56 = vadd.f32 %v498_v55, %v425_v53  ;;  %v500_v57 = vpop.f32.mrb[1].mxu0  ;;  %v910_v55 = vld [vmem:[%s1864_s7 + $0xa8] sm:$0xff] }
  0xfd   : > { %v501_v58 = vadd.f32 %v500_v57, %v429_v54 }
  0xfe   : > { %v545_v61 = vmax.f32 %v499_v56, 0.0 }
  0xff   : > { %v504_v59 = vpop.f32.mrb[2].mxu0  ;;  %v546_v60 = vmax.f32 %v501_v58, 0.0  ;;  %v893_v58 = vld [vmem:[%s1864_s7 + $0x20] sm:$0xff] }
 0x100   : > { %v505_v62 = vadd.f32 %v504_v59, %v425_v53  ;;  %v506_v63 = vpop.f32.mrb[3].mxu0  ;;  %v894_v59 = vld [vmem:[%s1864_s7 + $0x28] sm:$0xff] }
 0x101   : > { %v507_v0 = vadd.f32 %v506_v63, %v429_v54  ;;  %663 = vmatprep.mubr.f32.mxu1 %v546_v60  ;;  %v911_v60 = vld [vmem:[%s1864_s7 + $0xb0] sm:$0xff] }
 0x102   : > { %664 = vmatmul.mubr.f32.vlgmr.msra.gmra.mrb[0].mxu1 %v545_v61  ;;  %v547_v3 = vmax.f32 %v505_v62, 0.0  ;;  %v912_v61 = vld [vmem:[%s1864_s7 + $0xb8] sm:$0xff]  ;;  %v1343_v62 = vpack.c.bf16 %v894_v59, %v893_v58 }
 0x103   : > { %v548_v1 = vmax.f32 %v507_v0, 0.0  ;;  %v510_v2 = vpop.f32.mrb[4].mxu0  ;;  %1336 = vmatpush3.bf16.msra.mxu1 %v1335_v47  ;;  %v1345_v63 = vpack.c.bf16 %v912_v61, %v911_v60  ;;  %v895_v0 = vld [vmem:[%s1864_s7 + $0x30] sm:$0xff] }
 0x104   : > { %v511_v4 = vadd.f32 %v510_v2, %v425_v53  ;;  %v512_v5 = vpop.f32.mrb[5].mxu0  ;;  %1338 = vmatprep.subr.bf16.mxu1 %v1337_v48  ;;  %v913_v2 = vld [vmem:[%s1864_s7 + $0xc0] sm:$0xff] }
 0x105   : > { %v513_v6 = vadd.f32 %v512_v5, %v429_v54  ;;  %668 = vmatprep.mubr.f32.mxu1 %v548_v1  ;;  %v896_v1 = vld [vmem:[%s1864_s7 + $0x38] sm:$0xff] }
 0x106   : > { %669 = vmatmul.mubr.f32.gmra.mrb[2].mxu1 %v547_v3  ;;  %v549_v10 = vmax.f32 %v511_v4, 0.0  ;;  %v914_v3 = vld [vmem:[%s1864_s7 + $0xc8] sm:$0xff]  ;;  %v1347_v4 = vpack.c.bf16 %v896_v1, %v895_v0 }
 0x107   : > { %v550_v8 = vmax.f32 %v513_v6, 0.0  ;;  %v516_v9 = vpop.f32.mrb[6].mxu0  ;;  %v1349_v5 = vpack.c.bf16 %v914_v3, %v913_v2  ;;  %v897_v6 = vld [vmem:[%s1864_s7 + $0x40] sm:$0xff]  ;;  %v919_v2 = vld [vmem:[%s1864_s7 + $0xf0] sm:$0xff]  ;;  %v920_v3 = vld [vmem:[%s1864_s7 + $0xf8] sm:$0xff] }
 0x108   : > { %v517_v11 = vadd.f32 %v516_v9, %v425_v53  ;;  %v518_v12 = vpop.f32.mrb[7].mxu0  ;;  %v915_v9 = vld [vmem:[%s1864_s7 + $0xd0] sm:$0xff] }
 0x109   : > { %v519_v13 = vadd.f32 %v518_v12, %v429_v54  ;;  %673 = vmatprep.mubr.f32.mxu1 %v550_v8  ;;  %v898_v8 = vld [vmem:[%s1864_s7 + $0x48] sm:$0xff] }
 0x10a   : > { %674 = vmatmul.mubr.f32.gmra.mrb[4].mxu1 %v549_v10  ;;  %v551_v16 = vmax.f32 %v517_v11, 0.0  ;;  %v916_v10 = vld [vmem:[%s1864_s7 + $0xd8] sm:$0xff]  ;;  %v1351_v11 = vpack.c.bf16 %v898_v8, %v897_v6  ;;  %v379_v8 = vld [vmem:[%s1863_s6] sm:$0x3] }
 0x10b   : > { %v552_v14 = vmax.f32 %v519_v13, 0.0  ;;  %v522_v15 = vpop.f32.mrb[8].mxu0  ;;  %v1353_v12 = vpack.c.bf16 %v916_v10, %v915_v9  ;;  %v899_v13 = vld [vmem:[%s1864_s7 + $0x50] sm:$0xff]  ;;  %v729_v9 = vrot.slane %v379_v8, %v424_v50  ;;  %v733_v10 = vrot.slane %v379_v8, %v428_v52 }
 0x10c   : > { %v523_v17 = vadd.f32 %v522_v15, %v425_v53  ;;  %v524_v18 = vpop.f32.mrb[9].mxu0  ;;  %v917_v15 = vld [vmem:[%s1864_s7 + $0xe0] sm:$0xff] }
 0x10d   : > { %v525_v19 = vadd.f32 %v524_v18, %v429_v54  ;;  %678 = vmatprep.mubr.f32.mxu1 %v552_v14  ;;  %v900_v14 = vld [vmem:[%s1864_s7 + $0x58] sm:$0xff] }
 0x10e   : > { %679 = vmatmul.mubr.f32.gmra.mrb[6].mxu1 %v551_v16  ;;  %v553_v22 = vmax.f32 %v523_v17, 0.0  ;;  %v918_v16 = vld [vmem:[%s1864_s7 + $0xe8] sm:$0xff]  ;;  %v1355_v17 = vpack.c.bf16 %v900_v14, %v899_v13 }
 0x10f   : > { %v554_v20 = vmax.f32 %v525_v19, 0.0  ;;  %v528_v21 = vpop.f32.mrb[10].mxu0  ;;  %v1357_v18 = vpack.c.bf16 %v918_v16, %v917_v15  ;;  %v901_v19 = vld [vmem:[%s1864_s7 + $0x60] sm:$0xff] }
 0x110   : > { %v529_v23 = vadd.f32 %v528_v21, %v425_v53  ;;  %v530_v24 = vpop.f32.mrb[11].mxu0 }
 0x111   : > { %v531_v25 = vadd.f32 %v530_v24, %v429_v54  ;;  %683 = vmatprep.mubr.f32.mxu1 %v554_v20  ;;  %v902_v20 = vld [vmem:[%s1864_s7 + $0x68] sm:$0xff] }
 0x112   : > { %684 = vmatmul.mubr.f32.gmra.mrb[8].mxu1 %v553_v22  ;;  %v555_v28 = vmax.f32 %v529_v23, 0.0  ;;  %v1359_v21 = vpack.c.bf16 %v902_v20, %v901_v19  ;;  %v1141_v23 = vld [vmem:[%s1861_s4] ss:$0 sm:$0xff] }
 0x113   : > { %v556_v26 = vmax.f32 %v531_v25, 0.0  ;;  %v534_v27 = vpop.f32.mrb[12].mxu0 }
 0x114   : > { %v535_v29 = vadd.f32 %v534_v27, %v425_v53  ;;  %v536_v30 = vpop.f32.mrb[13].mxu0 }
 0x115   : > { %v537_v31 = vadd.f32 %v536_v30, %v429_v54  ;;  %688 = vmatprep.mubr.f32.mxu1 %v556_v26 }
 0x116   : > { %689 = vmatmul.mubr.f32.gmra.mrb[10].mxu1 %v555_v28  ;;  %v557_v34 = vmax.f32 %v535_v29, 0.0 }
 0x117   : > { %v558_v32 = vmax.f32 %v537_v31, 0.0  ;;  %v540_v33 = vpop.f32.mrb[14].mxu0 }
 0x118   : > { %v541_v35 = vadd.f32 %v540_v33, %v425_v53  ;;  %v542_v36 = vpop.f32.mrb[15].mxu0  ;;  %v892_v53 = vld [vmem:[%s1864_s7 + $0x18] sm:$0xff] }
 0x119   : > { %v543_v37 = vadd.f32 %v542_v36, %v429_v54  ;;  %693 = vmatprep.mubr.f32.mxu1 %v558_v32  ;;  %v909_v54 = vld [vmem:[%s1864_s7 + $0xa0] sm:$0xff]  ;;  %v1339_v56 = vpack.c.bf16 %v892_v53, %v891_v51 }
 0x11a   : > { %694 = vmatmul.mubr.f32.gmra.mrb[12].mxu1 %v557_v34  ;;  %v559_v39 = vmax.f32 %v541_v35, 0.0  ;;  %v1341_v57 = vpack.c.bf16 %v910_v55, %v909_v54 }
 0x11b   : > { %v560_v38 = vmax.f32 %v543_v37, 0.0  ;;  %1340 = vmatpush3.bf16.msra.mxu1 %v1339_v56 }
 0x11c   : > { %1342 = vmatprep.subr.bf16.mxu1 %v1341_v57 }
 0x11d   : > { %698 = vmatprep.mubr.f32.mxu1 %v560_v38 }
 0x11e   : > { %699 = vmatmul.mubr.f32.gmra.mrb[14].mxu1 %v559_v39 }
 0x11f   : > { %1344 = vmatpush3.bf16.msra.mxu1 %v1343_v62 }
 0x120   : > { %1346 = vmatprep.subr.bf16.mxu1 %v1345_v63 }
 0x123   : > { %1348 = vmatpush3.bf16.msra.mxu1 %v1347_v4  ;;  %v1361_v4 = vpack.c.bf16 %v920_v3, %v919_v2 }
 0x124   : > { %1350 = vmatprep.subr.bf16.mxu1 %v1349_v5  ;;  %v903_v5 = vld [vmem:[%s1864_s7 + $0x70] sm:$0xff] }
 0x127   : > { %1352 = vmatpush3.bf16.msra.mxu1 %v1351_v11 }
 0x128   : > { %1354 = vmatprep.subr.bf16.mxu1 %v1353_v12 }
 0x12b   : > { %1356 = vmatpush3.bf16.msra.mxu1 %v1355_v17 }
 0x12c   : > { %1358 = vmatprep.subr.bf16.mxu1 %v1357_v18 }
 0x12f   : > { %1360 = vmatpush3.bf16.msra.mxu1 %v1359_v21 }
 0x130   : > { %1362 = vmatprep.subr.bf16.mxu1 %v1361_v4 }
 0x1d5   : > { %v1185_v22 = vpop.f32.mrb[0].mxu1 }
 0x1d6   : > { %v1186_v24 = vpop.f32.mrb[1].mxu1 }
 0x1d7   : > { %v1187_v25 = vadd.f32 %v1186_v24, %v1185_v22 }
 0x1d9   : > { %v666_v26 = vadd.f32 %v1187_v25, %v1141_v23  ;;  %v1188_v27 = vpop.f32.mrb[2].mxu1 }
 0x1da   : > { %v1189_v28 = vpop.f32.mrb[3].mxu1 }
 0x1db   : > { %705 = vst.msk [vmem:[%s1785_s19] sm:$0xff] %vm704_vm0, %v666_v26  ;;  %v713_v29 = vmax.f32 %v666_v26, 0.0  ;;  %v1190_v30 = vadd.f32 %v1189_v28, %v1188_v27 }
 0x1dd   : > { %v671_v31 = vadd.f32 %v1190_v30, %v1141_v23  ;;  %v1191_v32 = vpop.f32.mrb[4].mxu1  ;;  %1142 = vmatmul.mubr.msk.f32.vlgmr.msra.gmra.mrb[16].mxu0 %vm704_vm0, %v713_v29 }
 0x1de   : > { %v1192_v33 = vpop.f32.mrb[5].mxu1  ;;  %830 = vmatprep.mubr.f32.mxu0 %v1382_v7 }
 0x1df   : > { %706 = vst.msk [vmem:[%s1785_s19 + $0x8] sm:$0xff] %vm704_vm0, %v671_v31  ;;  %v714_v34 = vmax.f32 %v671_v31, 0.0  ;;  %v1193_v35 = vadd.f32 %v1192_v33, %v1191_v32 }
 0x1e1   : > { %v676_v36 = vadd.f32 %v1193_v35, %v1141_v23  ;;  %v1194_v37 = vpop.f32.mrb[6].mxu1  ;;  %1143 = vmatmul.mubr.msk.f32.gmra.mrb[18].mxu0 %vm704_vm0, %v714_v34 }
 0x1e2   : > { %v1195_v38 = vpop.f32.mrb[7].mxu1  ;;  %836 = vmatprep.mubr.f32.mxu0 %v1382_v7 }
 0x1e3   : > { %707 = vst.msk [vmem:[%s1785_s19 + $0x10] sm:$0xff] %vm704_vm0, %v676_v36  ;;  %v715_v39 = vmax.f32 %v676_v36, 0.0  ;;  %v1196_v40 = vadd.f32 %v1195_v38, %v1194_v37 }
 0x1e5   : > { %v681_v41 = vadd.f32 %v1196_v40, %v1141_v23  ;;  %v1197_v42 = vpop.f32.mrb[8].mxu1  ;;  %1144 = vmatmul.mubr.msk.f32.gmra.mrb[20].mxu0 %vm704_vm0, %v715_v39 }
 0x1e6   : > { %v1198_v43 = vpop.f32.mrb[9].mxu1  ;;  %842 = vmatprep.mubr.f32.mxu0 %v1382_v7 }
 0x1e7   : > { %708 = vst.msk [vmem:[%s1785_s19 + $0x18] sm:$0xff] %vm704_vm0, %v681_v41  ;;  %v716_v44 = vmax.f32 %v681_v41, 0.0  ;;  %v1199_v45 = vadd.f32 %v1198_v43, %v1197_v42 }
 0x1e9   : > { %v686_v46 = vadd.f32 %v1199_v45, %v1141_v23  ;;  %v1200_v47 = vpop.f32.mrb[10].mxu1  ;;  %1145 = vmatmul.mubr.msk.f32.gmra.mrb[22].mxu0 %vm704_vm0, %v716_v44 }
 0x1ea   : > { %v1201_v48 = vpop.f32.mrb[11].mxu1  ;;  %848 = vmatprep.mubr.f32.mxu0 %v1382_v7 }
 0x1eb   : > { %709 = vst.msk [vmem:[%s1785_s19 + $0x20] sm:$0xff] %vm704_vm0, %v686_v46  ;;  %v717_v51 = vmax.f32 %v686_v46, 0.0  ;;  %v1202_v53 = vadd.f32 %v1201_v48, %v1200_v47 }
 0x1ed   : > { %v691_v54 = vadd.f32 %v1202_v53, %v1141_v23  ;;  %v1203_v55 = vpop.f32.mrb[12].mxu1  ;;  %1146 = vmatmul.mubr.msk.f32.gmra.mrb[24].mxu0 %vm704_vm0, %v717_v51 }
 0x1ee   : > { %v1204_v56 = vpop.f32.mrb[13].mxu1  ;;  %854 = vmatprep.mubr.f32.mxu0 %v1382_v7 }
 0x1ef   : > { %710 = vst.msk [vmem:[%s1785_s19 + $0x28] sm:$0xff] %vm704_vm0, %v691_v54  ;;  %v718_v57 = vmax.f32 %v691_v54, 0.0  ;;  %v1205_v58 = vadd.f32 %v1204_v56, %v1203_v55 }
 0x1f1   : > { %v696_v59 = vadd.f32 %v1205_v58, %v1141_v23  ;;  %v1206_v60 = vpop.f32.mrb[14].mxu1  ;;  %1147 = vmatmul.mubr.msk.f32.gmra.mrb[26].mxu0 %vm704_vm0, %v718_v57 }
 0x1f2   : > { %v1207_v61 = vpop.f32.mrb[15].mxu1  ;;  %860 = vmatprep.mubr.f32.mxu0 %v1382_v7 }
 0x1f3   : > { %711 = vst.msk [vmem:[%s1785_s19 + $0x30] sm:$0xff] %vm704_vm0, %v696_v59  ;;  %v719_v62 = vmax.f32 %v696_v59, 0.0  ;;  %v1208_v63 = vadd.f32 %v1207_v61, %v1206_v60  ;;  %v1150_v60 = vld [vmem:[%s1865_s8] ss:$0 sm:$0xff] }
 0x1f5   : > { %v701_v0 = vadd.f32 %v1208_v63, %v1141_v23  ;;  %1148 = vmatmul.mubr.msk.f32.gmra.mrb[28].mxu0 %vm704_vm0, %v719_v62 }
 0x1f6   : > { %866 = vmatprep.mubr.f32.mxu0 %v1382_v7  ;;  %v904_v7 = vld [vmem:[%s1864_s7 + $0x78] sm:$0xff] }
 0x1f7   : > { %712 = vst.msk [vmem:[%s1785_s19 + $0x38] sm:$0xff] %vm704_vm0, %v701_v0  ;;  %v720_v1 = vmax.f32 %v701_v0, 0.0  ;;  %v1363_v6 = vpack.c.bf16 %v904_v7, %v903_v5 }
 0x1f9   : > { %1149 = vmatmul.mubr.msk.f32.gmra.mrb[30].mxu0 %vm704_vm0, %v720_v1  ;;  %1364 = vmatpush3.bf16.msra.mxu1 %v1363_v6 }
 0x2b0   : > { %v826_v11 = vpop.f32.mrb[16].mxu0 }
 0x2b1   : > { %v827_v12 = vadd.f32 %v826_v11, %v729_v9  ;;  %v828_v13 = vpop.f32.mrb[17].mxu0 }
 0x2b2   : > { %v829_v14 = vadd.f32 %v828_v13, %v733_v10 }
 0x2b3   : > { %v873_v17 = vmax.f32 %v827_v12, 0.0 }
 0x2b4   : > { %v874_v15 = vmax.f32 %v829_v14, 0.0  ;;  %v832_v16 = vpop.f32.mrb[18].mxu0 }
 0x2b5   : > { %v833_v18 = vadd.f32 %v832_v16, %v729_v9  ;;  %v834_v19 = vpop.f32.mrb[19].mxu0 }
 0x2b6   : > { %v835_v20 = vadd.f32 %v834_v19, %v733_v10  ;;  %991 = vmatprep.mubr.f32.mxu1 %v874_v15 }
 0x2b7   : > { %992 = vmatmul.mubr.f32.vlgmr.msra.gmra.mrb[16].mxu1 %v873_v17  ;;  %v875_v23 = vmax.f32 %v833_v18, 0.0 }
 0x2b8   : > { %v876_v21 = vmax.f32 %v835_v20, 0.0  ;;  %v838_v22 = vpop.f32.mrb[20].mxu0 }
 0x2b9   : > { %v839_v24 = vadd.f32 %v838_v22, %v729_v9  ;;  %v840_v50 = vpop.f32.mrb[21].mxu0 }
 0x2ba   : > { %v841_v25 = vadd.f32 %v840_v50, %v733_v10  ;;  %996 = vmatprep.mubr.f32.mxu1 %v876_v21 }
 0x2bb   : > { %997 = vmatmul.mubr.f32.gmra.mrb[18].mxu1 %v875_v23  ;;  %v877_v26 = vmax.f32 %v839_v24, 0.0 }
 0x2bc   : > { %v878_v49 = vmax.f32 %v841_v25, 0.0  ;;  %v844_v52 = vpop.f32.mrb[22].mxu0 }
 0x2bd   : > { %v845_v27 = vadd.f32 %v844_v52, %v729_v9  ;;  %v846_v28 = vpop.f32.mrb[23].mxu0 }
 0x2be   : > { %v847_v29 = vadd.f32 %v846_v28, %v733_v10  ;;  %1001 = vmatprep.mubr.f32.mxu1 %v878_v49 }
 0x2bf   : > { %1002 = vmatmul.mubr.f32.gmra.mrb[20].mxu1 %v877_v26  ;;  %v879_v32 = vmax.f32 %v845_v27, 0.0 }
 0x2c0   : > { %v880_v30 = vmax.f32 %v847_v29, 0.0  ;;  %v850_v31 = vpop.f32.mrb[24].mxu0 }
 0x2c1   : > { %v851_v33 = vadd.f32 %v850_v31, %v729_v9  ;;  %v852_v34 = vpop.f32.mrb[25].mxu0 }
 0x2c2   : > { %v853_v35 = vadd.f32 %v852_v34, %v733_v10  ;;  %1006 = vmatprep.mubr.f32.mxu1 %v880_v30 }
 0x2c3   : > { %1007 = vmatmul.mubr.f32.gmra.mrb[22].mxu1 %v879_v32  ;;  %v881_v38 = vmax.f32 %v851_v33, 0.0 }
 0x2c4   : > { %v882_v36 = vmax.f32 %v853_v35, 0.0  ;;  %v856_v37 = vpop.f32.mrb[26].mxu0 }
 0x2c5   : > { %v857_v39 = vadd.f32 %v856_v37, %v729_v9  ;;  %v858_v40 = vpop.f32.mrb[27].mxu0 }
 0x2c6   : > { %v859_v41 = vadd.f32 %v858_v40, %v733_v10  ;;  %1011 = vmatprep.mubr.f32.mxu1 %v882_v36 }
 0x2c7   : > { %1012 = vmatmul.mubr.f32.gmra.mrb[24].mxu1 %v881_v38  ;;  %v883_v44 = vmax.f32 %v857_v39, 0.0 }
 0x2c8   : > { %v884_v42 = vmax.f32 %v859_v41, 0.0  ;;  %v862_v43 = vpop.f32.mrb[28].mxu0 }
 0x2c9   : > { %v863_v45 = vadd.f32 %v862_v43, %v729_v9  ;;  %v864_v46 = vpop.f32.mrb[29].mxu0 }
 0x2ca   : > { %v865_v47 = vadd.f32 %v864_v46, %v733_v10  ;;  %1016 = vmatprep.mubr.f32.mxu1 %v884_v42 }
 0x2cb   : > { %1017 = vmatmul.mubr.f32.gmra.mrb[26].mxu1 %v883_v44  ;;  %v885_v53 = vmax.f32 %v863_v45, 0.0 }
 0x2cc   : > { %v886_v48 = vmax.f32 %v865_v47, 0.0  ;;  %v868_v51 = vpop.f32.mrb[30].mxu0 }
 0x2cd   : > { %v869_v54 = vadd.f32 %v868_v51, %v729_v9  ;;  %v870_v55 = vpop.f32.mrb[31].mxu0 }
 0x2ce   : > { %v871_v56 = vadd.f32 %v870_v55, %v733_v10  ;;  %1021 = vmatprep.mubr.f32.mxu1 %v886_v48 }
 0x2cf   : > { %1022 = vmatmul.mubr.f32.gmra.mrb[28].mxu1 %v885_v53  ;;  %v887_v58 = vmax.f32 %v869_v54, 0.0 }
 0x2d0   : > { %v888_v57 = vmax.f32 %v871_v56, 0.0 }
 0x2d2   : > { %1026 = vmatprep.mubr.f32.mxu1 %v888_v57 }
 0x2d3   : > { %1027 = vmatmul.mubr.f32.gmra.mrb[30].mxu1 %v887_v58 }
 0x38a   : > { %v1241_v59 = vpop.f32.mrb[16].mxu1 }
 0x38b   : > { %v1242_v61 = vpop.f32.mrb[17].mxu1 }
 0x38c   : > { %v1243_v62 = vadd.f32 %v1242_v61, %v1241_v59 }
 0x38e   : > { %v994_v63 = vadd.f32 %v1243_v62, %v1150_v60  ;;  %v1244_v0 = vpop.f32.mrb[18].mxu1 }
 0x38f   : > { %v1245_v1 = vpop.f32.mrb[19].mxu1 }
 0x390   : > { %1032 = vst [vmem:[%s1844_s15] sm:$0xff] %v994_v63  ;;  %v1246_v2 = vadd.f32 %v1245_v1, %v1244_v0 }
 0x392   : > { %v999_v3 = vadd.f32 %v1246_v2, %v1150_v60  ;;  %v1247_v4 = vpop.f32.mrb[20].mxu1 }
 0x393   : > { %v1248_v5 = vpop.f32.mrb[21].mxu1 }
 0x394   : > { %1033 = vst [vmem:[%s1844_s15 + $0x8] sm:$0xff] %v999_v3  ;;  %v1249_v7 = vadd.f32 %v1248_v5, %v1247_v4 }
 0x396   : > { %v1004_v6 = vadd.f32 %v1249_v7, %v1150_v60  ;;  %v1250_v8 = vpop.f32.mrb[22].mxu1 }
 0x397   : > { %v1251_v9 = vpop.f32.mrb[23].mxu1 }
 0x398   : > { %1034 = vst [vmem:[%s1844_s15 + $0x10] sm:$0xff] %v1004_v6  ;;  %v1252_v10 = vadd.f32 %v1251_v9, %v1250_v8 }
 0x39a   : > { %v1009_v11 = vadd.f32 %v1252_v10, %v1150_v60  ;;  %v1253_v12 = vpop.f32.mrb[24].mxu1 }
 0x39b   : > { %v1254_v13 = vpop.f32.mrb[25].mxu1 }
 0x39c   : > { %1035 = vst [vmem:[%s1844_s15 + $0x18] sm:$0xff] %v1009_v11  ;;  %v1255_v14 = vadd.f32 %v1254_v13, %v1253_v12 }
 0x39e   : > { %v1014_v15 = vadd.f32 %v1255_v14, %v1150_v60  ;;  %v1256_v16 = vpop.f32.mrb[26].mxu1 }
 0x39f   : > { %v1257_v17 = vpop.f32.mrb[27].mxu1 }
 0x3a0   : > { %1036 = vst [vmem:[%s1844_s15 + $0x20] sm:$0xff] %v1014_v15  ;;  %v1258_v18 = vadd.f32 %v1257_v17, %v1256_v16 }
 0x3a2   : > { %v1019_v19 = vadd.f32 %v1258_v18, %v1150_v60  ;;  %v1259_v20 = vpop.f32.mrb[28].mxu1 }
 0x3a3   : > { %v1260_v21 = vpop.f32.mrb[29].mxu1 }
 0x3a4   : > { %1037 = vst [vmem:[%s1844_s15 + $0x28] sm:$0xff] %v1019_v19  ;;  %v1261_v22 = vadd.f32 %v1260_v21, %v1259_v20 }
 0x3a6   : > { %v1024_v23 = vadd.f32 %v1261_v22, %v1150_v60  ;;  %v1262_v24 = vpop.f32.mrb[30].mxu1 }
 0x3a7   : > { %v1263_v50 = vpop.f32.mrb[31].mxu1 }
 0x3a8   : > { %1038 = vst [vmem:[%s1844_s15 + $0x30] sm:$0xff] %v1024_v23  ;;  %v1264_v25 = vadd.f32 %v1263_v50, %v1262_v24 }
 0x3aa   : > { %v1029_v49 = vadd.f32 %v1264_v25, %v1150_v60 }
 0x3ac   : > { %1039 = vst [vmem:[%s1844_s15 + $0x38] sm:$0xff] %v1029_v49 }
 0x3ad PF: > { %s21_s13 = sadd.s32 1, %s1380_s13  }
 0x3ae   : > { %p18_p4 = scmp.ge.s32.totalorder %s21_s13, 4  }
 0x3b0   :  { %20 = sbr.rel (!%p18_p4) target bundleno = 1 (0x1), region = 98 }

</bundles_post_ra>
